<compile_context>
chip_gen: v6e
topology: v6e:2x2x1
jax: 0.10.0
libtpu: 0.0.40
codegen_flags: <defaults>
</compile_context>

<pallas_src>
import jax
import jax.numpy as jnp
from jax.experimental import pallas as pl
from jax.experimental.pallas import tpu as pltpu

_MIB = 1024 * 1024


# ----------------------------- kernels --------------------------------------


def _se_fused_kernel(x_ref, w1_ref, b1_ref, w2_ref, b2_ref, o_ref):
    # x_ref block: (Bn, C, HW) -- channels on sublanes, spatial on lanes.
    # Spatial mean with f32 accumulation only (no full f32 copy of the block).
    pooled = jnp.mean(x_ref[...], axis=-1, dtype=jnp.float32)          # (Bn, C)
    # squeeze 1x1 conv: (Bn,C) @ (C,S) + bias, ReLU (f32)
    h = jnp.dot(pooled, w1_ref[...],
                preferred_element_type=jnp.float32) + b1_ref[...]      # (Bn, S)
    h = jnp.maximum(h, 0.0)
    # expand 1x1 conv: (Bn,S) @ (S,C) + bias, sigmoid (f32)
    g = jnp.dot(h, w2_ref[...],
                preferred_element_type=jnp.float32) + b2_ref[...]      # (Bn, C)
    g = jax.nn.sigmoid(g)
    # Gate in the input dtype (keeps bf16 packed on v6e/v7x; broadcast over lanes).
    o_ref[...] = x_ref[...] * g.astype(o_ref.dtype)[:, :, None]


def _se_apply_gate_kernel(x_ref, g_ref, o_ref):
    # x_ref: (1, C, THW), g_ref: (1, C, 1) -- lane-dense elementwise gating in
    # the input dtype (gate was pre-cast in the wrapper).
    o_ref[...] = x_ref[...] * g_ref[...]


# ----------------------------- helpers ---------------------------------------


def _vmem_capacity_bytes():
    try:
        return int(pltpu.get_tpu_info().vmem_capacity_bytes)
    except Exception:
        return 64 * _MIB  # conservative: v7x per-TensorCore capacity


def _pick_batch_block(n, per_sample_bytes, max_block_bytes, target_block_bytes=2 * _MIB):
    """Smallest divisor bn of n with bn*per_sample_bytes >= target (and <= max);
    if none reaches the target, the largest fitting divisor; None if even bn=1
    does not fit (caller should use the two-pass fallback)."""
    divs = [d for d in range(1, n + 1) if n % d == 0]
    fitting = [d for d in divs if d * per_sample_bytes <= max_block_bytes]
    if not fitting:
        return None
    for d in fitting:
        if d * per_sample_bytes >= target_block_bytes:
            return d
    return fitting[-1]


# ----------------------------- wrapper ---------------------------------------


def spatial_gate_2d(x_nchw, w_sq, b_sq, w_ex, b_ex, *, vmem_budget_bytes=None):
    """SpatialGate2d forward. x: (N,C,H,W); w_sq: (S,C); b_sq: (S,);
    w_ex: (C,S); b_ex: (C,). Returns (N,C,H,W) in x.dtype.

    vmem_budget_bytes: optional override for the pipelined-buffer budget of the
    fused path (mainly for tests / forcing the fallback)."""
    N, C, H, W = x_nchw.shape
    S = w_sq.shape[0]
    HW = H * W
    dtype = x_nchw.dtype
    itemsize = jnp.dtype(dtype).itemsize

    # NCHW -> (N, C, HW): contiguous reshape, no transpose, no extra HBM pass.
    x = x_nchw.reshape(N, C, HW)

    w1t = jnp.transpose(w_sq).astype(jnp.float32)        # (C, S)
    b1 = b_sq.reshape(1, S).astype(jnp.float32)          # (1, S)
    w2t = jnp.transpose(w_ex).astype(jnp.float32)        # (S, C)
    b2 = b_ex.reshape(1, C).astype(jnp.float32)          # (1, C)
    weights_bytes = 4 * (C * S + S + S * C + C)

    # --------- VMEM sizing (per-generation, with headroom) ----------
    vmem_cap = _vmem_capacity_bytes()
    if vmem_budget_bytes is None:
        # Budget for the double-buffered in+out blocks of the fused path:
        # leave >=16 MiB headroom and never use more than 3/4 of physical VMEM.
        pipeline_budget = min(vmem_cap - 16 * _MIB, (vmem_cap * 3) // 4)
    else:
        pipeline_budget = int(vmem_budget_bytes)
    # (in x2 double-buffer) + (out x2 double-buffer) = 4x the block data.
    max_block_bytes = max(0, pipeline_budget // 4)

    per_sample_bytes = C * HW * itemsize
    bn = _pick_batch_block(N, per_sample_bytes, max_block_bytes) if max_block_bytes > 0 else None

    if bn is not None:
        # ---------------- fused single-pass path (1 read + 1 write of x) ----
        grid = (N // bn,)
        block_bytes = bn * per_sample_bytes
        pipelined_bytes = 4 * block_bytes + 2 * weights_bytes
        vmem_limit = int(min(vmem_cap - 2 * _MIB,
                             max(pipelined_bytes + 8 * _MIB, 16 * _MIB)))

        cost = pl.CostEstimate(
            flops=int(2 * N * C * HW + 4 * N * C * S),
            transcendentals=int(N * C),
            bytes_accessed=int(2 * N * C * HW * itemsize + weights_bytes),
        )

        out = pl.pallas_call(
            _se_fused_kernel,
            out_shape=jax.ShapeDtypeStruct((N, C, HW), dtype),
            grid_spec=pltpu.PrefetchScalarGridSpec(
                num_scalar_prefetch=0,
                grid=grid,
                in_specs=[
                    pl.BlockSpec((bn, C, HW), lambda n: (n, 0, 0)),
                    pl.BlockSpec((C, S), lambda n: (0, 0)),
                    pl.BlockSpec((1, S), lambda n: (0, 0)),
                    pl.BlockSpec((S, C), lambda n: (0, 0)),
                    pl.BlockSpec((1, C), lambda n: (0, 0)),
                ],
                out_specs=pl.BlockSpec((bn, C, HW), lambda n: (n, 0, 0)),
            ),
            compiler_params=pltpu.CompilerParams(
                dimension_semantics=("parallel",),
                vmem_limit_bytes=vmem_limit,
            ),
            cost_estimate=cost,
        )(x, w1t, b1, w2t, b2)
        return out.reshape(N, C, H, W)

    # ---------------- two-pass fallback (very large per-sample maps) ---------
    # Pass 1 (plain XLA, cheap): (N, C) channel gate with f32 accumulation;
    # no f32 copy of x is materialized (reduction dtype fuses the upcast).
    pooled = jnp.mean(x, axis=-1, dtype=jnp.float32)                   # (N, C)
    h = jnp.maximum(jnp.dot(pooled, w1t) + b1, 0.0)                    # (N, S)
    g = jax.nn.sigmoid(jnp.dot(h, w2t) + b2)                           # (N, C)
    g = g.astype(dtype).reshape(N, C, 1)                               # (N, C, 1)

    # Pass 2 (Pallas): lane-dense HW-tiled x * g.
    # Tile so the double-buffered in+out footprint stays ~16 MiB (512-2048+
    # lanes already reach ~85% of HBM roofline; bigger buys nothing).
    fb_tile_budget = 16 * _MIB
    thw_cap = max(128, fb_tile_budget // (4 * C * itemsize))
    thw_cap = min(thw_cap, 8192)
    if thw_cap >= HW:
        thw = HW
    else:
        thw = max(128, (thw_cap // 128) * 128)
    grid = (N, pl.cdiv(HW, thw))

    tile_bytes = C * thw * itemsize
    fb_pipelined = 4 * tile_bytes + 4 * C * itemsize
    fb_vmem_limit = int(min(vmem_cap - 2 * _MIB,
                            max(fb_pipelined + 8 * _MIB, 24 * _MIB)))

    cost = pl.CostEstimate(
        flops=int(N * C * HW),
        transcendentals=0,
        bytes_accessed=int(2 * N * C * HW * itemsize + N * C * itemsize),
    )

    out = pl.pallas_call(
        _se_apply_gate_kernel,
        out_shape=jax.ShapeDtypeStruct((N, C, HW), dtype),
        grid_spec=pltpu.PrefetchScalarGridSpec(
            num_scalar_prefetch=0,
            grid=grid,
            in_specs=[
                pl.BlockSpec((1, C, thw), lambda n, t: (n, 0, t)),
                pl.BlockSpec((1, C, 1), lambda n, t: (n, 0, 0)),
            ],
            out_specs=pl.BlockSpec((1, C, thw), lambda n, t: (n, 0, t)),
        ),
        compiler_params=pltpu.CompilerParams(
            dimension_semantics=("parallel", "parallel"),
            vmem_limit_bytes=fb_vmem_limit,
        ),
        cost_estimate=cost,
    )(x, g)
    return out.reshape(N, C, H, W)


# ----------------------------- reference & test ------------------------------


def _reference(x_nchw, w_sq, b_sq, w_ex, b_ex):
    pooled = jnp.mean(x_nchw, axis=(2, 3))                             # (N, C)
    h = jnp.maximum(pooled @ w_sq.T + b_sq, 0.0)                       # (N, S)
    g = jax.nn.sigmoid(h @ w_ex.T + b_ex)                              # (N, C)
    return x_nchw * g[:, :, None, None]


if __name__ == "__main__":
    # SpatialGate2d(channels=4, reduction=2) -> squeeze_channels = 2
    N, C, H, W = 2, 4, 16, 16
    reduction = 2
    S = max(1, C // reduction)

    key = jax.random.PRNGKey(0)
    kx, k1, k2, k3, k4 = jax.random.split(key, 5)
    x = jax.random.normal(kx, (N, C, H, W), dtype=jnp.float32)

    # deterministic synthetic params (Conv2d(C->S,1x1) and Conv2d(S->C,1x1))
    w_sq = jax.random.normal(k1, (S, C), dtype=jnp.float32) * 0.5      # squeeze weight
    b_sq = jax.random.normal(k2, (S,), dtype=jnp.float32) * 0.1        # squeeze bias
    w_ex = jax.random.normal(k3, (C, S), dtype=jnp.float32) * 0.5      # expand weight
    b_ex = jax.random.normal(k4, (C,), dtype=jnp.float32) * 0.1        # expand bias

    ref = _reference(x, w_sq, b_sq, w_ex, b_ex)

    # fused single-pass path
    out = jax.block_until_ready(spatial_gate_2d(x, w_sq, b_sq, w_ex, b_ex))
    assert out.shape == (N, C, H, W)
    assert jnp.allclose(out, ref, atol=1e-5, rtol=1e-5), "fused path mismatch"

    # also exercise the two-pass fallback (taken when the per-sample block is
    # too large for the fused pipeline budget, e.g. huge maps on v7x).
    out_fb = jax.block_until_ready(
        spatial_gate_2d(x, w_sq, b_sq, w_ex, b_ex, vmem_budget_bytes=1))
    assert jnp.allclose(out_fb, ref, atol=1e-5, rtol=1e-5), "fallback path mismatch"

    print("KERNEL_OK")
</pallas_src>

<mosaic_0001>
module attributes {stable_mosaic.version = 11 : i64} {
  func.func @_se_fused_kernel(%arg0: i32, %arg1: memref<2x4x256xf32, #tpu.memory_space<vmem>>, %arg2: memref<4x2xf32, #tpu.memory_space<vmem>>, %arg3: memref<1x2xf32, #tpu.memory_space<vmem>>, %arg4: memref<2x4xf32, #tpu.memory_space<vmem>>, %arg5: memref<1x4xf32, #tpu.memory_space<vmem>>, %arg6: memref<2x4x256xf32, #tpu.memory_space<vmem>>) attributes {dimension_semantics = [#tpu.dimension_semantics<parallel>], iteration_bounds = array<i64: 1>, scalar_prefetch = 0 : i64, scratch_operands = 0 : i64, tpu.core_type = #tpu.core_type<tc>, window_params = [{transform_indices = @transform_0, window_bounds = array<i64: 2, 4, 256>}, {pipeline_mode = #tpu.pipeline_mode<synchronous>, transform_indices = @transform_1, window_bounds = array<i64: 4, 2>}, {pipeline_mode = #tpu.pipeline_mode<synchronous>, transform_indices = @transform_2, window_bounds = array<i64: 1, 2>}, {pipeline_mode = #tpu.pipeline_mode<synchronous>, transform_indices = @transform_3, window_bounds = array<i64: 2, 4>}, {pipeline_mode = #tpu.pipeline_mode<synchronous>, transform_indices = @transform_4, window_bounds = array<i64: 1, 4>}, {transform_indices = @transform_5, window_bounds = array<i64: 2, 4, 256>}]} {
    %c0 = arith.constant 0 : index
    %c0_0 = arith.constant 0 : index
    %c0_1 = arith.constant 0 : index
    %0 = vector.load %arg1[%c0, %c0_0, %c0_1] : memref<2x4x256xf32, #tpu.memory_space<vmem>>, vector<2x4x256xf32>
    %cst = arith.constant dense<0.000000e+00> : vector<2x4xf32>
    %1 = vector.multi_reduction <add>, %0, %cst [2] : vector<2x4x256xf32> to vector<2x4xf32>
    %cst_2 = arith.constant 2.560000e+02 : f32
    %2 = vector.broadcast %cst_2 : f32 to vector<2x4xf32>
    %3 = arith.divf %1, %2 : vector<2x4xf32>
    %c0_3 = arith.constant 0 : index
    %c0_4 = arith.constant 0 : index
    %4 = vector.load %arg2[%c0_3, %c0_4] : memref<4x2xf32, #tpu.memory_space<vmem>>, vector<4x2xf32>
    %cst_5 = arith.constant dense<0.000000e+00> : vector<2x2xf32>
    %5 = tpu.matmul %3, %4, %cst_5 {dimension_numbers = #tpu.dot_dimension_numbers<[1], [0], [0], [1], [0, 0, 1, 1], [], []>} : vector<2x4xf32>, vector<4x2xf32>, vector<2x2xf32> -> vector<2x2xf32>
    %c0_6 = arith.constant 0 : index
    %c0_7 = arith.constant 0 : index
    %6 = vector.load %arg3[%c0_6, %c0_7] : memref<1x2xf32, #tpu.memory_space<vmem>>, vector<1x2xf32>
    %7 = vector.broadcast %6 : vector<1x2xf32> to vector<2x2xf32>
    %8 = arith.addf %5, %7 : vector<2x2xf32>
    %cst_8 = arith.constant 0.000000e+00 : f32
    %9 = vector.broadcast %cst_8 : f32 to vector<2x2xf32>
    %10 = arith.maximumf %8, %9 : vector<2x2xf32>
    %c0_9 = arith.constant 0 : index
    %c0_10 = arith.constant 0 : index
    %11 = vector.load %arg4[%c0_9, %c0_10] : memref<2x4xf32, #tpu.memory_space<vmem>>, vector<2x4xf32>
    %cst_11 = arith.constant dense<0.000000e+00> : vector<2x4xf32>
    %12 = tpu.matmul %10, %11, %cst_11 {dimension_numbers = #tpu.dot_dimension_numbers<[1], [0], [0], [1], [0, 0, 1, 1], [], []>} : vector<2x2xf32>, vector<2x4xf32>, vector<2x4xf32> -> vector<2x4xf32>
    %c0_12 = arith.constant 0 : index
    %c0_13 = arith.constant 0 : index
    %13 = vector.load %arg5[%c0_12, %c0_13] : memref<1x4xf32, #tpu.memory_space<vmem>>, vector<1x4xf32>
    %14 = vector.broadcast %13 : vector<1x4xf32> to vector<2x4xf32>
    %15 = arith.addf %12, %14 : vector<2x4xf32>
    %16 = arith.negf %15 : vector<2x4xf32>
    %17 = math.exp %16 : vector<2x4xf32>
    %cst_14 = arith.constant 1.000000e+00 : f32
    %18 = vector.broadcast %cst_14 : f32 to vector<2x4xf32>
    %19 = arith.addf %18, %17 : vector<2x4xf32>
    %20 = arith.divf %18, %19 : vector<2x4xf32>
    %c0_15 = arith.constant 0 : index
    %c0_16 = arith.constant 0 : index
    %c0_17 = arith.constant 0 : index
    %21 = vector.load %arg1[%c0_15, %c0_16, %c0_17] : memref<2x4x256xf32, #tpu.memory_space<vmem>>, vector<2x4x256xf32>
    %22 = vector.shape_cast %20 : vector<2x4xf32> to vector<2x4x1xf32>
    %23 = vector.broadcast %22 : vector<2x4x1xf32> to vector<2x4x256xf32>
    %24 = arith.mulf %21, %23 : vector<2x4x256xf32>
    %c0_18 = arith.constant 0 : index
    %c0_19 = arith.constant 0 : index
    %c0_20 = arith.constant 0 : index
    %25 = vector.load %arg6[%c0_18, %c0_19, %c0_20] : memref<2x4x256xf32, #tpu.memory_space<vmem>>, vector<2x4x256xf32>
    tpu.vector_store %arg6[%c0_18, %c0_19, %c0_20], %24 {strides = array<i32>} : memref<2x4x256xf32, #tpu.memory_space<vmem>>, vector<2x4x256xf32>,
    return
  }
  func.func @transform_0(%arg0: i32) -> (i32, i32, i32) {
    %c0_i32 = arith.constant 0 : i32
    %c0_i32_0 = arith.constant 0 : i32
    %c0_i32_1 = arith.constant 0 : i32
    return %arg0, %c0_i32, %c0_i32_0 : i32, i32, i32
  }
  func.func @transform_1(%arg0: i32) -> (i32, i32) {
    %c0_i32 = arith.constant 0 : i32
    %c0_i32_0 = arith.constant 0 : i32
    %c0_i32_1 = arith.constant 0 : i32
    return %c0_i32, %c0_i32_0 : i32, i32
  }
  func.func @transform_2(%arg0: i32) -> (i32, i32) {
    %c0_i32 = arith.constant 0 : i32
    %c0_i32_0 = arith.constant 0 : i32
    %c0_i32_1 = arith.constant 0 : i32
    return %c0_i32, %c0_i32_0 : i32, i32
  }
  func.func @transform_3(%arg0: i32) -> (i32, i32) {
    %c0_i32 = arith.constant 0 : i32
    %c0_i32_0 = arith.constant 0 : i32
    %c0_i32_1 = arith.constant 0 : i32
    return %c0_i32, %c0_i32_0 : i32, i32
  }
  func.func @transform_4(%arg0: i32) -> (i32, i32) {
    %c0_i32 = arith.constant 0 : i32
    %c0_i32_0 = arith.constant 0 : i32
    %c0_i32_1 = arith.constant 0 : i32
    return %c0_i32, %c0_i32_0 : i32, i32
  }
  func.func @transform_5(%arg0: i32) -> (i32, i32, i32) {
    %c0_i32 = arith.constant 0 : i32
    %c0_i32_0 = arith.constant 0 : i32
    %c0_i32_1 = arith.constant 0 : i32
    return %arg0, %c0_i32, %c0_i32_0 : i32, i32, i32
  }
}

</mosaic_0001>

<bundles_post_ra>
// kernel: tpu_custom_call.1
= control target key start
LH: loop header
LB: loop body
LE: loop exit
PB: predicated region body
PF: predicated region fallthrough
CT: control target
= control target key end

     0   :  { %10 = vsyncpa [#allocation3], 0  ;;  %s457_s0 = inlined_call_operand.hbm [shape: f32[2,4,256], index: 0, kind: input, shape index: {}]   ;;  %s458_s1 = inlined_call_operand.vmem [shape: f32[4,2], index: 1, kind: input, shape index: {}]   ;;  %s459_s2 = inlined_call_operand.vmem [shape: f32[1,2], index: 2, kind: input, shape index: {}]   ;;  %s460_s3 = inlined_call_operand.vmem [shape: f32[2,4], index: 3, kind: input, shape index: {}]   ;;  %s461_s4 = inlined_call_operand.vmem [shape: f32[1,4], index: 4, kind: input, shape index: {}]   ;;  %s462_s5 = inlined_call_operand.hbm [shape: f32[2,4,256], index: 5, kind: output, shape index: {}]  }
   0x1   :  { %11 = vsyncpa [#allocation4], 0  ;;  %s379_s18 = smov [#allocation2]  }
   0x2   :  { %s17_s19 = sshll.u32 %s379_s18, 4  ;;  %s18_s19 = int_to_ptr.vmem [resolvable:$true] %s17_s19 }
   0x3   :  { %s343_s20 = scalar_lea.vmem %s18_s19, 256  ;;  %p348_p1 = scmp.lt.s32.totalorder %s18_s19, %s18_s19 }
   0x4   :  { %p344_p0 = scmp.ne.s32.totalorder %s18_s19, %s343_s20  ;;  %p349_p2 = scmp.lt.s32.totalorder %s343_s20, %s343_s20 }
   0x6   :  { %p350_p3 = por %p349_p2, %p348_p1 }
   0x8   :  { %p351_p4 = pnand %p350_p3, %p344_p0 }
   0xa   :  { %354 = shalt.err (!%p351_p4)
}
   0xb   :  { %s380_s21 = smov 128   ;;  %s381_s22 = smov 8  }
   0xc   :  { %23 = dma.hbm_to_vmem [thread:$0]  %s457_s0, 256, %s18_s19, [#allocation3], %s380_s21, %s380_s21, %s381_s22  }
   0xd   :  { %375 = dma.done.wait [#allocation3], 256  }
   0xe   :  { %376 = vsyncadd [#allocation3], 4294967040  ;;  %vm43_vm0 = vcmask 1043456   ;;  %v422_v0 = vld [vmem:[#allocation2] sm:$0xff]  ;;  %v424_v1 = vld [vmem:[#allocation2 + $0x8] sm:$0xff]  ;;  %v382_v11 = vmov 0.0   ;;  %v67_v12 = vlaneseq }
   0xf   :  { %v39_v2 = vcombine.high %v422_v0, %v422_v0  ;;  %v44_v3 = vsel %vm43_vm0, %v422_v0, 0.0  ;;  %v40_v4 = vcombine.high %v424_v1, %v424_v1  ;;  %v49_v6 = vsel %vm43_vm0, %v424_v1, 0.0  ;;  %v57_v10 = vld [vmem:[%s458_s1] sm:$0xf]  ;;  %312 = vmatprep.subr.mxu0 %v382_v11  ;;  %317 = vmatprep.subr.mxu1 %v382_v11 }
  0x10   :  { %vm383_vm1 = vmmov 0   ;;  %313 = vmatpush3.msk.msra.mxu0 %vm43_vm0, %v57_v10  ;;  %v68_v13 = vand.u32 127, %v67_v12  ;;  %v70_v14 = vshrl.u32 %v67_v12, 7  ;;  %vm77_vm2 = vcmask 1041409   ;;  %v156_v23 = vld [vmem:[%s460_s3] sm:$0x3] }
  0x11   :  { %v45_v5 = vsel %vm43_vm0, %v39_v2, 0.0  ;;  %v50_v7 = vsel %vm43_vm0, %v40_v4, 0.0  ;;  %314 = vmatprep.mubr.msk.f32.mxu0 %vm383_vm1, %v382_v11  ;;  %319 = vmatprep.mubr.msk.f32.mxu1 %vm383_vm1, %v382_v11  ;;  %vm79_vm3 = vcmask 31744   ;;  %vm168_vm4 = vcmask 1041408   ;;  %v301_v24 = vld [vmem:[%s459_s2] ss:$0 sm:$0xff] }
  0x12   :  { %v46_v8 = vadd.f32 %v45_v5, %v44_v3  ;;  %v51_v9 = vadd.f32 %v50_v7, %v49_v6  ;;  %v71_v16 = vsub.s32 %v68_v13, %v70_v14  ;;  %318 = vmatpush3.msk.msra.mxu1 %vm168_vm4, %v156_v23  ;;  %vm164_vm5 = vcmask 15360   ;;  %v304_v29 = vld [vmem:[%s461_s4] ss:$0 sm:$0xff]  ;;  %s385_s2 = smov [#allocation5]  }
  0x13   :  { %v250_v36 = vsub.s32 0, %v70_v14  ;;  %v257_v39 = vsub.s32 1, %v70_v14  ;;  %v384_v41 = vmov 839922192   ;;  %s289_s3 = sshll.u32 %s385_s2, 4  ;;  %s290_s3 = int_to_ptr.vmem [resolvable:$true] %s289_s3 }
  0x14   :  { %47 = vadd.xlane.f32.xlu0 %v46_v8  ;;  %v265_v42 = vunpack.c.l.s4 %v384_v41  ;;  %s355_s4 = scalar_lea.vmem %s290_s3, 256  ;;  %p360_p6 = scmp.lt.s32.totalorder %s290_s3, %s290_s3 }
  0x15   :  { %p356_p5 = scmp.ne.s32.totalorder %s290_s3, %s355_s4  ;;  %p361_p7 = scmp.lt.s32.totalorder %s355_s4, %s355_s4 }
  0x16   :  { %v266_v43 = vunpack.c.0.s8 %v265_v42 }
  0x17   :  { %p362_p8 = por %p361_p7, %p360_p6 }
  0x18   :  { %52 = vadd.xlane.f32.xlu0 %v51_v9  ;;  %v269_v44 = vsub.s32 %v266_v43, %v70_v14 }
  0x19   :  { %p363_p9 = pnand %p362_p8, %p356_p5 }
  0x9d   :  { %v48_v15 = vpop.xlane.xlu0 %47 }
  0x9e   :  { %v55_v17 = vmul.f32 0.00390625, %v48_v15 }
  0xa0   :  { %v72_v20 = vrot.slane %v55_v17, %v71_v16 }
  0xa1   :  { %v53_v18 = vpop.xlane.xlu0 %52 }
  0xa2   :  { %v56_v19 = vmul.f32 0.00390625, %v53_v18 }
  0xa4   :  { %v76_v21 = vrot.slane %v56_v19, %v71_v16 }
  0xa6   :  { %v78_v22 = vsel %vm77_vm2, %v76_v21, %v72_v20 }
  0xa7   :  { %315 = vmatmul.mubr.msk.f32.vlgmr.msra.gmra.mxu0 %vm79_vm3, %v78_v22 }
 0x167   :  { %v151_v25 = vpop.f32.mrf.mxu0 }
 0x168   :  { %v152_v26 = vadd.f32 %v301_v24, %v151_v25 }
 0x169   :  { %v316_v27 = vpop.f32.mrf.mxu0 }
 0x16a   :  { %v155_v28 = vmax.f32 %v152_v26, 0.0 }
 0x16c   :  { %320 = vmatmul.mubr.msk.f32.vlgmr.msra.gmra.mxu1 %vm164_vm5, %v155_v28 }
 0x22c   :  { %v238_v30 = vpop.f32.mrf.mxu1 }
 0x22d   :  { %v239_v31 = vadd.f32 %v304_v29, %v238_v30 }
 0x22e   :  { %v321_v32 = vpop.f32.mrf.mxu1 }
 0x22f   :  { %v307_v33 = vmul.f32 -1.442695, %v239_v31 }
 0x231   :  { %331 = vpow2.f32 %v307_v33 }
 0x23e   :  { %v332_v34 = vpop.eup %331 }
 0x23f   :  { %v245_v35 = vadd.f32 1.0, %v332_v34 }
 0x241   :  { %333 = vrcp.f32 %v245_v35 }
 0x24e   :  { %v334_v37 = vpop.eup %333 }
 0x24f   :  { %v251_v38 = vrot.slane %v334_v37, %v250_v36  ;;  %v258_v40 = vrot.slane %v334_v37, %v257_v39 }
 0x251   :  { %253 = vbcast.lane.b32.xlu1 %v251_v38, 256 }
 0x255   :  { %260 = vbcast.lane.b32.xlu1 %v258_v40, 256 }
 0x2c3   :  { %v254_v45 = vpop.permute.xlu1 %253 }
 0x2c4   :  { %v270_v46 = vrot.slane %v254_v45, %v269_v44 }
 0x2c6   :  { %v280_v47 = vmul.f32 %v270_v46, %v422_v0 }
 0x2c7   :  { %v261_v48 = vpop.permute.xlu1 %260 }
 0x2c8   :  { %282 = vst [vmem:[#allocation5] sm:$0xff] %v280_v47  ;;  %v277_v49 = vrot.slane %v261_v48, %v269_v44 }
 0x2ca   :  { %v281_v50 = vmul.f32 %v277_v49, %v424_v1 }
 0x2cc   :  { %283 = vst [vmem:[#allocation5 + $0x8] sm:$0xff] %v281_v50 }
 0x2cd   :  { %366 = shalt.err (!%p363_p9)
}
 0x2ce   :  { %295 = dma.vmem_to_hbm [thread:$0]  %s290_s3, 256, %s462_s5, [#allocation4], %s380_s21, %s380_s21, %s381_s22  }
 0x2cf   :  { %377 = dma.done.wait [#allocation4], 256  }
 0x2d0   :  { %378 = vsyncadd [#allocation4], 4294967040 }
 0x2d1   :  { %299 = vsyncpa [#allocation3], 1 }
 0x2d2   :  { %300 = vsyncpa [#allocation4], 1 }

</bundles_post_ra>
